<compile_context>
chip_gen: v7x
topology: tpu7x:2x2x1
jax: 0.10.0
libtpu: 0.0.40
codegen_flags: <defaults>
</compile_context>

<pallas_src>
from functools import lru_cache

import jax
import jax.numpy as jnp
from jax.experimental import pallas as pl
from jax.experimental.pallas import tpu as pltpu


def _posemb_kernel(inv_freq_ref, out_ref):
    # inv_freq_ref: (1, half)  float32, resident in VMEM across all tiles
    # out_ref:      (TS, dim)  x.dtype, one sequence tile
    ts = out_ref.shape[0]
    half = inv_freq_ref.shape[-1]

    # Global row index for this tile: program_id(0) * TS + local row.
    rows = pl.program_id(0) * ts + jax.lax.broadcasted_iota(jnp.int32, (ts, half), 0)
    t = rows.astype(jnp.float32)                      # (TS, half)
    sinusoid = t * inv_freq_ref[...]                  # outer product via broadcast

    # Two slab stores instead of a lane-axis concatenate.
    out_ref[:, :half] = jnp.sin(sinusoid).astype(out_ref.dtype)
    out_ref[:, half:] = jnp.cos(sinusoid).astype(out_ref.dtype)


def _choose_tile(seq, dim, itemsize):
    """Pick a seq-tile so one output block is <= ~4 MiB and a multiple of 8."""
    bytes_per_row = max(dim * itemsize, 1)
    ts = min(512, (4 << 20) // bytes_per_row)
    ts = max(8, (ts // 8) * 8)                        # multiple of 8, >= 8
    if seq <= ts:
        return seq                                    # full extent (always legal)
    return ts


@lru_cache(maxsize=64)
def _build_table(seq, dim, dtype_name):
    """Builds the (1, seq, dim) positional-embedding table with a Pallas kernel."""
    dtype = jnp.dtype(dtype_name)
    half = dim // 2

    inv_freq = 1.0 / (10000.0 ** (jnp.arange(0, dim, 2, dtype=jnp.float32) / dim))
    inv_freq = inv_freq.reshape(1, half)              # 2-D for TPU layout

    ts = _choose_tile(seq, dim, dtype.itemsize)
    grid = (pl.cdiv(seq, ts),)

    emb = pl.pallas_call(
        _posemb_kernel,
        out_shape=jax.ShapeDtypeStruct((seq, dim), dtype),
        grid=grid,
        in_specs=[pl.BlockSpec((1, half), lambda i: (0, 0))],   # resident, not re-DMA'd
        out_specs=pl.BlockSpec((ts, dim), lambda i: (i, 0)),
        compiler_params=pltpu.CompilerParams(
            dimension_semantics=("parallel",),
        ),
    )(inv_freq)

    return emb[None, :, :]                            # (1, seq, dim)


def fixed_positional_embedding(x, dim, seq_dim=1):
    """Returns (1, seq, dim) sinusoidal embedding table, dtype == x.dtype."""
    assert dim % 2 == 0, "FixedPositionalEmbedding requires an even dim"
    seq = x.shape[seq_dim]
    return _build_table(int(seq), int(dim), jnp.dtype(x.dtype).name)


def _reference(seq, dim, dtype):
    t = jnp.arange(seq, dtype=jnp.float32)
    inv_freq = 1.0 / (10000.0 ** (jnp.arange(0, dim, 2, dtype=jnp.float32) / dim))
    sin_inp = jnp.einsum("i,j->ij", t, inv_freq)
    return jnp.concatenate([jnp.sin(sin_inp), jnp.cos(sin_inp)], axis=-1)[None].astype(dtype)


if __name__ == "__main__":
    key = jax.random.PRNGKey(0)

    # Small shape matching the module's expected (B, S, D) layout.
    B, S, D = 2, 8, 32
    x = jax.random.normal(key, (B, S, D), dtype=jnp.float32)

    out = fixed_positional_embedding(x, dim=D, seq_dim=1)
    out = jax.block_until_ready(out)
    ref = _reference(S, D, x.dtype)
    assert out.shape == (1, S, D), out.shape
    assert out.dtype == x.dtype
    assert jnp.allclose(out, ref, atol=1e-5, rtol=1e-5)

    # Second check exercising the multi-tile / partial-last-block path.
    S2 = 520
    x2 = jax.random.normal(key, (1, S2, D), dtype=jnp.float32)
    out2 = jax.block_until_ready(fixed_positional_embedding(x2, dim=D, seq_dim=1))
    ref2 = _reference(S2, D, x2.dtype)
    assert out2.shape == (1, S2, D), out2.shape
    assert jnp.allclose(out2, ref2, atol=1e-5, rtol=1e-5)

    print("KERNEL_OK")
</pallas_src>

<mosaic_0001>
module attributes {stable_mosaic.version = 11 : i64} {
  func.func @_posemb_kernel(%arg0: i32, %arg1: memref<1x16xf32, #tpu.memory_space<vmem>>, %arg2: memref<8x32xf32, #tpu.memory_space<vmem>>) attributes {dimension_semantics = [#tpu.dimension_semantics<parallel>], iteration_bounds = array<i64: 1>, scalar_prefetch = 0 : i64, scratch_operands = 0 : i64, tpu.core_type = #tpu.core_type<tc>, window_params = [{pipeline_mode = #tpu.pipeline_mode<synchronous>, transform_indices = @transform_0, window_bounds = array<i64: 1, 16>}, {transform_indices = @transform_1, window_bounds = array<i64: 8, 32>}]} {
    %c8_i32 = arith.constant 8 : i32
    %0 = arith.muli %arg0, %c8_i32 : i32
    %1 = tpu.iota {dimensions = array<i32: 0>} : vector<8x16xi32>
    %2 = vector.broadcast %0 : i32 to vector<8x16xi32>
    %3 = arith.addi %2, %1 : vector<8x16xi32>
    %4 = arith.sitofp %3 : vector<8x16xi32> to vector<8x16xf32>
    %c0 = arith.constant 0 : index
    %c0_0 = arith.constant 0 : index
    %5 = vector.load %arg1[%c0, %c0_0] : memref<1x16xf32, #tpu.memory_space<vmem>>, vector<1x16xf32>
    %6 = vector.broadcast %5 : vector<1x16xf32> to vector<8x16xf32>
    %7 = arith.mulf %4, %6 : vector<8x16xf32>
    %8 = math.sin %7 : vector<8x16xf32>
    %c0_1 = arith.constant 0 : index
    %c0_2 = arith.constant 0 : index
    %9 = vector.load %arg2[%c0_1, %c0_2] : memref<8x32xf32, #tpu.memory_space<vmem>>, vector<8x16xf32>
    tpu.vector_store %arg2[%c0_1, %c0_2], %8 {strides = array<i32>} : memref<8x32xf32, #tpu.memory_space<vmem>>, vector<8x16xf32>,
    %10 = math.cos %7 : vector<8x16xf32>
    %c0_3 = arith.constant 0 : index
    %c16 = arith.constant 16 : index
    %11 = vector.load %arg2[%c0_3, %c16] : memref<8x32xf32, #tpu.memory_space<vmem>>, vector<8x16xf32>
    tpu.vector_store %arg2[%c0_3, %c16], %10 {strides = array<i32>} : memref<8x32xf32, #tpu.memory_space<vmem>>, vector<8x16xf32>,
    return
  }
  func.func @transform_0(%arg0: i32) -> (i32, i32) {
    %c0_i32 = arith.constant 0 : i32
    %c0_i32_0 = arith.constant 0 : i32
    %c0_i32_1 = arith.constant 0 : i32
    return %c0_i32, %c0_i32_0 : i32, i32
  }
  func.func @transform_1(%arg0: i32) -> (i32, i32) {
    %c0_i32 = arith.constant 0 : i32
    %c0_i32_0 = arith.constant 0 : i32
    return %arg0, %c0_i32 : i32, i32
  }
}

</mosaic_0001>

<bundles_post_ra>
// kernel: tpu_custom_call.1
= control target key start
LH: loop header
LB: loop body
LE: loop exit
PB: predicated region body
PF: predicated region fallthrough
CT: control target
= control target key end

     0   :  { %6 = vsyncpa [#allocation3], 0  ;;  %s403_s0 = inlined_call_operand.hbm [shape: f32[1,16], index: 0, kind: input, shape index: {}]   ;;  %s404_s1 = inlined_call_operand.hbm [shape: f32[8,32], index: 1, kind: output, shape index: {}]  }
   0x1   :  { %7 = vsyncpa [#allocation4], 0  ;;  %s339_s6 = smov [#allocation2]   ;;  %s291_s10 = scalar_lea.hbm %s403_s0, 16 }
   0x2   :  { %s14_s7 = sshll.u32 %s339_s6, 4  ;;  %p292_p0 = scmp.ne.s32.totalorder %s403_s0, %s291_s10  ;;  %s15_s7 = int_to_ptr.vmem [resolvable:$true] %s14_s7 }
   0x3   :  { %p295_p1 = scmp.lt.u32.totalorder %s291_s10, %s403_s0 }
   0x5   :  { %p297_p2 = pnand %p295_p1, %p292_p0 }
   0x7   :  { %300 = shalt.err (!%p297_p2)
}
   0x8   :  { %s301_s15 = scalar_lea.vmem %s15_s7, 16  ;;  %s305_s16 = scalar_lea.vmem %s15_s7, 32 }
   0x9   :  { %p302_p3 = scmp.ne.s32.totalorder %s15_s7, %s301_s15  ;;  %p306_p4 = scmp.lt.s32.totalorder %s15_s7, %s15_s7 }
   0xa   :  { %p307_p5 = scmp.lt.s32.totalorder %s305_s16, %s301_s15 }
   0xc   :  { %p308_p6 = por %p307_p5, %p306_p4 }
   0xe   :  { %p309_p7 = pnand %p308_p6, %p302_p3 }
  0x10   :  { %312 = shalt.err (!%p309_p7)
}
  0x11   :  { %17 = dma.hbm_to_vmem [thread:$0]  %s403_s0, 16, %s15_s7, [#allocation3]  }
  0x12   :  { %335 = dma.done.wait [#allocation3], 16  }
  0x13   :  { %336 = vsyncadd [#allocation3], 4294967280  ;;  %v22_v0 = vlaneseq  ;;  %v265_v3 = vld [vmem:[#allocation2] ss:$0 sm:$0xff]  ;;  %v340_v16 = vmov 683565275  }
  0x14   :  { %v341_v18 = vmov 2475754826   ;;  %v342_v20 = vmov 2131351028   ;;  %v343_v22 = vmov 2102212464  }
  0x15   :  { %v23_v1 = vshrl.u32 %v22_v0, 7  ;;  %v344_v24 = vmov 920167782   ;;  %v345_v31 = vmov 1326507024   ;;  %s346_s0 = smov 16  }
  0x16   :  { %s347_s19 = smov [#allocation5]  }
  0x17   :  { %v26_v2 = vcvt.s32.f32 %v23_v1  ;;  %s256_s20 = sshll.u32 %s347_s19, 4  ;;  %s257_s20 = int_to_ptr.vmem [resolvable:$true] %s256_s20 }
  0x18   :  { %s313_s21 = scalar_lea.vmem %s257_s20, 128  ;;  %p318_p9 = scmp.lt.s32.totalorder %s257_s20, %s257_s20 }
  0x19   :  { %v370_v4 = vmul.f32 %v265_v3, %v26_v2  ;;  %p314_p8 = scmp.ne.s32.totalorder %s257_s20, %s313_s21  ;;  %p319_p10 = scmp.lt.s32.totalorder %s313_s21, %s313_s21 }
  0x1b   :  { %v38_v5 = vand.u32 2139095040, %v370_v4  ;;  %v35_v7 = vand.u32 2147483647, %v370_v4  ;;  %vm37_vm7 = vcmp.lt.s32.totalorder %v370_v4, 0  ;;  %vm127_vm15 = vweird.f32 %v370_v4  ;;  %p320_p11 = por %p319_p10, %p318_p9 }
  0x1d   :  { %v39_v6 = vshrl.u32 %v38_v5, 23  ;;  %v42_v10 = vand.u32 8388607, %v35_v7  ;;  %vm36_vm8 = vcmp.le.f32.partialorder %v35_v7, 0.7853982  ;;  %p321_p12 = pnand %p320_p11, %p314_p8 }
  0x1f   :  { %v266_v8 = vadd.s32 4294967169, %v39_v6  ;;  %v43_v13 = vor.u32 8388608, %v42_v10 }
  0x21   :  { %v45_v9 = vadd.s32 1, %v266_v8  ;;  %v83_v33 = vshll.u32 %v43_v13, 8 }
  0x23   :  { %vm46_vm0 = vcmp.gt.s32.totalorder %v45_v9, 0 }
  0x24   :  { %v47_v11 = vsel %vm46_vm0, %v45_v9, 0  ;;  %vm139_vm0 = vcmask 130048  }
  0x25   :  { %v49_v12 = vand.u32 31, %v47_v11  ;;  %v48_v14 = vshrl.u32 %v47_v11, 5 }
  0x27   :  { %v50_v15 = vsub.s32 32, %v49_v12  ;;  %v52_v17 = vshll.u32 %v340_v16, %v49_v12  ;;  %v55_v19 = vshll.u32 %v341_v18, %v49_v12  ;;  %v58_v21 = vshll.u32 %v342_v20, %v49_v12 }
  0x28   :  { %v61_v23 = vshll.u32 %v343_v22, %v49_v12  ;;  %v64_v25 = vshll.u32 %v344_v24, %v49_v12  ;;  %vm67_vm1 = vcmp.lt.s32.totalorder %v48_v14, 1  ;;  %vm70_vm2 = vcmp.lt.s32.totalorder %v48_v14, 4 }
  0x29   :  { %v51_v26 = vshrl.u32 %v340_v16, %v50_v15  ;;  %v53_v27 = vshrl.u32 %v341_v18, %v50_v15  ;;  %v56_v28 = vshrl.u32 %v342_v20, %v50_v15  ;;  %v59_v29 = vshrl.u32 %v343_v22, %v50_v15 }
  0x2a   :  { %v62_v30 = vshrl.u32 %v344_v24, %v50_v15  ;;  %v65_v32 = vshrl.u32 %v345_v31, %v50_v15  ;;  %vm68_vm3 = vcmp.lt.s32.totalorder %v48_v14, 2  ;;  %vm69_vm4 = vcmp.lt.s32.totalorder %v48_v14, 3 }
  0x2b   :  { %v54_v34 = vor.u32 %v53_v27, %v52_v17  ;;  %v57_v35 = vor.u32 %v56_v28, %v55_v19  ;;  %v60_v36 = vor.u32 %v59_v29, %v58_v21 }
  0x2c   :  { %v63_v37 = vor.u32 %v62_v30, %v61_v23  ;;  %v66_v38 = vor.u32 %v65_v32, %v64_v25 }
  0x2d   :  { %v71_v39 = vsel %vm67_vm1, %v51_v26, %v54_v34  ;;  %v72_v40 = vsel %vm70_vm2, %v60_v36, 2102212464  ;;  %v75_v41 = vsel %vm67_vm1, %v54_v34, %v57_v35  ;;  %v79_v42 = vsel %vm67_vm1, %v57_v35, %v60_v36 }
  0x2e   :  { %v73_v43 = vsel %vm69_vm4, %v57_v35, %v72_v40  ;;  %v76_v44 = vsel %vm70_vm2, %v63_v37, 920167782  ;;  %v80_v45 = vsel %vm70_vm2, %v66_v38, 1326507024  ;;  %vm248_vm1 = vcmask 261248  }
  0x2f   :  { %v77_v46 = vsel %vm69_vm4, %v60_v36, %v76_v44  ;;  %v81_v47 = vsel %vm69_vm4, %v63_v37, %v80_v45  ;;  %v74_v48 = vsel %vm68_vm3, %v71_v39, %v73_v43 }
  0x30   :  { %v78_v49 = vsel %vm68_vm3, %v75_v41, %v77_v46  ;;  %v82_v50 = vsel %vm68_vm3, %v79_v42, %v81_v47  ;;  %v90_v55 = vmul.u32 %v83_v33, %v74_v48 }
  0x31   :  { %v376_v51 = vmul.u32.u64.low %v83_v33, %v82_v50  ;;  %v377_v52 = vmul.u32.u64.high %v83_v33, %v82_v50, %v376_v51  ;;  %v379_v53 = vmul.u32.u64.low %v83_v33, %v78_v49  ;;  %v380_v54 = vmul.u32.u64.high %v83_v33, %v78_v49, %v379_v53 }
  0x33   :  { %vm92_vm5 = vc.u32 %v377_v52, %v379_v53  ;;  %v93_v56 = vadd.s32 1, %v380_v54  ;;  %v91_v3 = vadd.s32 %v379_v53, %v377_v52 }
  0x35   :  { %v94_v57 = vsel %vm92_vm5, %v93_v56, %v380_v54 }
  0x36   :  { %v95_v58 = vadd.s32 %v94_v57, %v90_v55 }
  0x38   :  { %v96_v59 = vadd.s32 536870912, %v95_v58 }
  0x3a   :  { %v97_v60 = vshrl.u32 %v96_v59, 30 }
  0x3c   :  { %v98_v61 = vshll.u32 %v97_v60, 30  ;;  %v121_v18 = vsub.s32 4, %v97_v60 }
  0x3e   :  { %v99_v62 = vsub.s32 %v95_v58, %v98_v61  ;;  %v122_v21 = vsel %vm37_vm7, %v121_v18, %v97_v60 }
  0x3f   :  { %v124_v23 = vsel %vm36_vm8, 0, %v122_v21 }
  0x40   :  { %v101_v63 = vsub.s32 0, %v99_v62  ;;  %v128_v24 = vadd.s32 3, %v124_v23  ;;  %v234_v26 = vand.u32 3, %v124_v23 }
  0x42   :  { %v267_v0 = vmin.u32 %v101_v63, %v99_v62  ;;  %v129_v25 = vand.u32 3, %v128_v24  ;;  %vm239_vm10 = vcmp.eq.s32.totalorder %v234_v26, 2  ;;  %vm236_vm12 = vcmp.eq.s32.totalorder %v234_v26, 0 }
  0x43   :  { %vm235_vm14 = vcmp.lt.s32.totalorder %v234_v26, 2 }
  0x44   :  { %v103_v1 = vclz %v267_v0  ;;  %vm134_vm9 = vcmp.eq.s32.totalorder %v129_v25, 2  ;;  %vm131_vm11 = vcmp.eq.s32.totalorder %v129_v25, 0  ;;  %vm130_vm13 = vcmp.lt.s32.totalorder %v129_v25, 2 }
  0x46   :  { %v268_v2 = vadd.s32 4294967294, %v103_v1 }
  0x48   :  { %vm269_vm6 = vcmp.lt.s32.totalorder %v268_v2, 0 }
  0x49   :  { %v106_v5 = vsel %vm269_vm6, 0, %v268_v2 }
  0x4a   :  { %v107_v6 = vsub.s32 32, %v106_v5  ;;  %v108_v8 = vshll.u32 %v99_v62, %v106_v5  ;;  %v111_v9 = vsub.s32 4294967266, %v106_v5 }
  0x4c   :  { %v109_v10 = vshrl.u32 %v91_v3, %v107_v6  ;;  %v112_v11 = vadd.s32 127, %v111_v9 }
  0x4e   :  { %v110_v12 = vor.u32 %v109_v10, %v108_v8  ;;  %v113_v13 = vshll.u32 %v112_v11, 23 }
  0x50   :  { %v114_v14 = vor.u32 4788187, %v113_v13  ;;  %v117_v15 = vcvt.s32.f32 %v110_v12 }
  0x52   :  { %v115_v16 = vand.u32 2147483647, %v114_v14 }
  0x54   :  { %v118_v17 = vmul.f32 %v117_v15, %v115_v16 }
  0x56   :  { %v119_v19 = vxor.u32 2147483648, %v118_v17 }
  0x58   :  { %v120_v20 = vsel %vm37_vm7, %v119_v19, %v118_v17 }
  0x59   :  { %v123_v22 = vsel %vm36_vm8, %v370_v4, %v120_v20 }
  0x5a   :  { %287 = vcosq.f32 %v123_v22 }
  0x5b   :  { %289 = vsinq.f32 %v123_v22 }
  0x64   :  { %v288_v27 = vpop.eup %287 }
  0x65   :  { %v290_v28 = vpop.eup %289  ;;  %v135_v29 = vxor.u32 2147483648, %v288_v27 }
  0x66   :  { %v132_v7 = vxor.u32 2147483648, %v290_v28 }
  0x67   :  { %v136_v30 = vsel %vm134_vm9, %v135_v29, %v290_v28  ;;  %v241_v31 = vsel %vm239_vm10, %v135_v29, %v290_v28 }
  0x68   :  { %v133_v32 = vsel %vm131_vm11, %v288_v27, %v132_v7  ;;  %v238_v33 = vsel %vm236_vm12, %v288_v27, %v132_v7 }
  0x69   :  { %v137_v34 = vsel %vm130_vm13, %v133_v32, %v136_v30  ;;  %v242_v35 = vsel %vm235_vm14, %v238_v33, %v241_v31 }
  0x6a   :  { %v138_v36 = vsel %vm127_vm15, nan, %v137_v34  ;;  %v243_v37 = vsel %vm127_vm15, nan, %v242_v35 }
  0x6b   :  { %140 = vst.msk [vmem:[#allocation5] sm:$0xff] %vm139_vm0, %v138_v36  ;;  %245 = vrot.lane.b32.xlu0 %v243_v37, %s346_s0 }
  0xdd   :  { %v246_v38 = vpop.permute.xlu0 %245 }
  0xde   :  { %249 = vst.msk [vmem:[#allocation5] sm:$0xff] %vm248_vm1, %v246_v38 }
  0xdf   :  { %324 = shalt.err (!%p321_p12)
}
  0xe0   :  { %s325_s24 = scalar_lea.hbm %s404_s1, 128 }
  0xe1   :  { %p326_p13 = scmp.ne.s32.totalorder %s404_s1, %s325_s24  ;;  %p329_p0 = scmp.lt.u32.totalorder %s325_s24, %s404_s1 }
  0xe3   :  { %p331_p1 = pnand %p329_p0, %p326_p13 }
  0xe5   :  { %334 = shalt.err (!%p331_p1)
}
  0xe6   :  { %259 = dma.vmem_to_hbm [thread:$0]  %s257_s20, 128, %s404_s1, [#allocation4]  }
  0xe7   :  { %337 = dma.done.wait [#allocation4], 128  }
  0xe8   :  { %338 = vsyncadd [#allocation4], 4294967168 }
  0xe9   :  { %263 = vsyncpa [#allocation3], 1 }
  0xea   :  { %264 = vsyncpa [#allocation4], 1 }

</bundles_post_ra>
